<compile_context>
chip_gen: v7x
topology: tpu7x:2x2x1
jax: 0.10.0
libtpu: 0.0.40
codegen_flags: <defaults>
</compile_context>

<pallas_src>
import jax
import jax.numpy as jnp
from jax.experimental import pallas as pl
from jax.experimental.pallas import tpu as pltpu

HIDDEN = 256


def _round_up(x, m):
    return ((x + m - 1) // m) * m


def _critic_kernel(s_ref, a_ref, w1s_ref, w1a_ref, b1_ref, w2_ref, b2_ref,
                   w3_ref, b3_ref, out_ref):
    # Layer 1: fused "concat" — two MXU pushes into the same f32 accumulator.
    h1 = jnp.dot(s_ref[...], w1s_ref[...], preferred_element_type=jnp.float32)
    h1 = h1 + jnp.dot(a_ref[...], w1a_ref[...], preferred_element_type=jnp.float32)
    h1 = jnp.maximum(h1 + b1_ref[...], 0.0)                       # [TM, 256]

    # Layer 2: Linear + ReLU on the MXU.
    h2 = jnp.dot(h1, w2_ref[...], preferred_element_type=jnp.float32) + b2_ref[...]
    h2 = jnp.maximum(h2, 0.0)                                      # [TM, 256]

    # Layer 3: N=1 output -> VPU multiply + lane reduction (keeps the MXU free and
    # avoids a full vmatmul push/drain for a 1-wide result).
    q = jnp.sum(h2 * w3_ref[...], axis=-1, keepdims=True) + b3_ref[...]
    out_ref[...] = q                                               # [TM, 1]


def critic_forward(state, action, params, *, max_tile=512):
    """Fused Critic forward. state: [B, S], action: [B, A] -> q: [B, 1]."""
    w1_s, w1_a, b1, w2, b2, w3, b3 = params
    state = state.astype(jnp.float32)
    action = action.astype(jnp.float32)

    B, S = state.shape
    A = action.shape[1]

    # Batch tile: multiple of 8 (sublane), capped so per-step VMEM stays small.
    TM = min(max_tile, _round_up(B, 8))
    Bp = _round_up(B, TM)
    if Bp != B:
        pad = Bp - B
        state = jnp.pad(state, ((0, pad), (0, 0)))
        action = jnp.pad(action, ((0, pad), (0, 0)))

    grid = (Bp // TM,)

    # Activations stream per grid step; weights/biases use constant index maps so
    # they are fetched once and stay VMEM-resident across grid steps.
    resident = lambda a: pl.BlockSpec(a.shape, lambda i: (0,) * a.ndim)

    out = pl.pallas_call(
        _critic_kernel,
        out_shape=jax.ShapeDtypeStruct((Bp, 1), jnp.float32),
        grid=grid,
        in_specs=[
            pl.BlockSpec((TM, S), lambda i: (i, 0)),    # state tile
            pl.BlockSpec((TM, A), lambda i: (i, 0)),    # action tile
            resident(w1_s),
            resident(w1_a),
            resident(b1),
            resident(w2),
            resident(b2),
            resident(w3),
            resident(b3),
        ],
        out_specs=pl.BlockSpec((TM, 1), lambda i: (i, 0)),
        compiler_params=pltpu.CompilerParams(
            dimension_semantics=("parallel",)),
    )(state, action, w1_s, w1_a, b1, w2, b2, w3, b3)

    return out[:B]


def init_critic_params(key, state_dim, action_dim):
    """Deterministic PyTorch-style init (U[-1/sqrt(fan_in), 1/sqrt(fan_in)]).

    Weights are stored transposed as [in_features, out_features]; l1's weight is
    split along its input dim into the state part and the action part.
    """
    dims = [(state_dim + action_dim, HIDDEN), (HIDDEN, HIDDEN), (HIDDEN, 1)]
    raw = []
    for (fan_in, fan_out) in dims:
        key, kw, kb = jax.random.split(key, 3)
        bound = 1.0 / jnp.sqrt(jnp.float32(fan_in))
        w = jax.random.uniform(kw, (fan_in, fan_out), jnp.float32, -bound, bound)
        b = jax.random.uniform(kb, (1, fan_out), jnp.float32, -bound, bound)
        raw.extend([w, b])
    w1, b1, w2, b2, w3, b3 = raw
    w1_s = w1[:state_dim]                 # [S, 256]
    w1_a = w1[state_dim:]                 # [A, 256]
    w3_row = w3.T                         # [1, 256]  (row vector for VPU reduce)
    return (w1_s, w1_a, b1, w2, b2, w3_row, b3)


def critic_ref(state, action, params):
    """Pure-JAX reference for correctness checking."""
    w1_s, w1_a, b1, w2, b2, w3, b3 = params
    state = state.astype(jnp.float32)
    action = action.astype(jnp.float32)
    h1 = jnp.maximum(state @ w1_s + action @ w1_a + b1, 0.0)
    h2 = jnp.maximum(h1 @ w2 + b2, 0.0)
    return h2 @ w3.T + b3


if __name__ == "__main__":
    state_dim, action_dim = 17, 6

    key = jax.random.PRNGKey(0)
    kp, ks, ka = jax.random.split(key, 3)
    params = init_critic_params(kp, state_dim, action_dim)

    # Small RL-style batch (single grid step, whole batch in one tile).
    batch = 8
    state = jax.random.normal(ks, (batch, state_dim), jnp.float32)
    action = jax.random.normal(ka, (batch, action_dim), jnp.float32)

    q = critic_forward(state, action, params)
    q = jax.block_until_ready(q)
    q_ref = critic_ref(state, action, params)
    assert q.shape == (batch, 1), q.shape
    assert jnp.allclose(q, q_ref, atol=1e-4, rtol=1e-4), (q, q_ref)

    # Larger, non-aligned batch: exercises padding + multi-step batch grid with
    # VMEM-resident weights.
    batch2 = 600
    ks2, ka2 = jax.random.split(jax.random.PRNGKey(1))
    state2 = jax.random.normal(ks2, (batch2, state_dim), jnp.float32)
    action2 = jax.random.normal(ka2, (batch2, action_dim), jnp.float32)

    q2 = critic_forward(state2, action2, params)
    q2 = jax.block_until_ready(q2)
    q2_ref = critic_ref(state2, action2, params)
    assert q2.shape == (batch2, 1), q2.shape
    assert jnp.allclose(q2, q2_ref, atol=1e-4, rtol=1e-4)

    print("KERNEL_OK")
</pallas_src>

<mosaic_0001>
module attributes {stable_mosaic.version = 11 : i64} {
  func.func @_critic_kernel(%arg0: i32, %arg1: memref<8x17xf32, #tpu.memory_space<vmem>>, %arg2: memref<8x6xf32, #tpu.memory_space<vmem>>, %arg3: memref<17x256xf32, #tpu.memory_space<vmem>>, %arg4: memref<6x256xf32, #tpu.memory_space<vmem>>, %arg5: memref<1x256xf32, #tpu.memory_space<vmem>>, %arg6: memref<256x256xf32, #tpu.memory_space<vmem>>, %arg7: memref<1x256xf32, #tpu.memory_space<vmem>>, %arg8: memref<1x256xf32, #tpu.memory_space<vmem>>, %arg9: memref<1x1xf32, #tpu.memory_space<vmem>>, %arg10: memref<8x1xf32, #tpu.memory_space<vmem>>) attributes {dimension_semantics = [#tpu.dimension_semantics<parallel>], iteration_bounds = array<i64: 1>, scalar_prefetch = 0 : i64, scratch_operands = 0 : i64, tpu.core_type = #tpu.core_type<tc>, window_params = [{transform_indices = @transform_0, window_bounds = array<i64: 8, 17>}, {transform_indices = @transform_1, window_bounds = array<i64: 8, 6>}, {pipeline_mode = #tpu.pipeline_mode<synchronous>, transform_indices = @transform_2, window_bounds = array<i64: 17, 256>}, {pipeline_mode = #tpu.pipeline_mode<synchronous>, transform_indices = @transform_3, window_bounds = array<i64: 6, 256>}, {pipeline_mode = #tpu.pipeline_mode<synchronous>, transform_indices = @transform_4, window_bounds = array<i64: 1, 256>}, {pipeline_mode = #tpu.pipeline_mode<synchronous>, transform_indices = @transform_5, window_bounds = array<i64: 256, 256>}, {pipeline_mode = #tpu.pipeline_mode<synchronous>, transform_indices = @transform_6, window_bounds = array<i64: 1, 256>}, {pipeline_mode = #tpu.pipeline_mode<synchronous>, transform_indices = @transform_7, window_bounds = array<i64: 1, 256>}, {pipeline_mode = #tpu.pipeline_mode<synchronous>, transform_indices = @transform_8, window_bounds = array<i64: 1, 1>}, {transform_indices = @transform_9, window_bounds = array<i64: 8, 1>}]} {
    %c0 = arith.constant 0 : index
    %c0_0 = arith.constant 0 : index
    %0 = vector.load %arg1[%c0, %c0_0] : memref<8x17xf32, #tpu.memory_space<vmem>>, vector<8x17xf32>
    %c0_1 = arith.constant 0 : index
    %c0_2 = arith.constant 0 : index
    %1 = vector.load %arg3[%c0_1, %c0_2] : memref<17x256xf32, #tpu.memory_space<vmem>>, vector<17x256xf32>
    %cst = arith.constant dense<0.000000e+00> : vector<8x256xf32>
    %2 = tpu.matmul %0, %1, %cst {dimension_numbers = #tpu.dot_dimension_numbers<[1], [0], [0], [1], [0, 0, 1, 1], [], []>} : vector<8x17xf32>, vector<17x256xf32>, vector<8x256xf32> -> vector<8x256xf32>
    %c0_3 = arith.constant 0 : index
    %c0_4 = arith.constant 0 : index
    %3 = vector.load %arg2[%c0_3, %c0_4] : memref<8x6xf32, #tpu.memory_space<vmem>>, vector<8x6xf32>
    %c0_5 = arith.constant 0 : index
    %c0_6 = arith.constant 0 : index
    %4 = vector.load %arg4[%c0_5, %c0_6] : memref<6x256xf32, #tpu.memory_space<vmem>>, vector<6x256xf32>
    %cst_7 = arith.constant dense<0.000000e+00> : vector<8x256xf32>
    %5 = tpu.matmul %3, %4, %cst_7 {dimension_numbers = #tpu.dot_dimension_numbers<[1], [0], [0], [1], [0, 0, 1, 1], [], []>} : vector<8x6xf32>, vector<6x256xf32>, vector<8x256xf32> -> vector<8x256xf32>
    %6 = arith.addf %2, %5 : vector<8x256xf32>
    %c0_8 = arith.constant 0 : index
    %c0_9 = arith.constant 0 : index
    %7 = vector.load %arg5[%c0_8, %c0_9] : memref<1x256xf32, #tpu.memory_space<vmem>>, vector<1x256xf32>
    %8 = vector.broadcast %7 : vector<1x256xf32> to vector<8x256xf32>
    %9 = arith.addf %6, %8 : vector<8x256xf32>
    %cst_10 = arith.constant 0.000000e+00 : f32
    %10 = vector.broadcast %cst_10 : f32 to vector<8x256xf32>
    %11 = arith.maximumf %9, %10 : vector<8x256xf32>
    %c0_11 = arith.constant 0 : index
    %c0_12 = arith.constant 0 : index
    %12 = vector.load %arg6[%c0_11, %c0_12] : memref<256x256xf32, #tpu.memory_space<vmem>>, vector<256x256xf32>
    %cst_13 = arith.constant dense<0.000000e+00> : vector<8x256xf32>
    %13 = tpu.matmul %11, %12, %cst_13 {dimension_numbers = #tpu.dot_dimension_numbers<[1], [0], [0], [1], [0, 0, 1, 1], [], []>} : vector<8x256xf32>, vector<256x256xf32>, vector<8x256xf32> -> vector<8x256xf32>
    %c0_14 = arith.constant 0 : index
    %c0_15 = arith.constant 0 : index
    %14 = vector.load %arg7[%c0_14, %c0_15] : memref<1x256xf32, #tpu.memory_space<vmem>>, vector<1x256xf32>
    %15 = vector.broadcast %14 : vector<1x256xf32> to vector<8x256xf32>
    %16 = arith.addf %13, %15 : vector<8x256xf32>
    %cst_16 = arith.constant 0.000000e+00 : f32
    %17 = vector.broadcast %cst_16 : f32 to vector<8x256xf32>
    %18 = arith.maximumf %16, %17 : vector<8x256xf32>
    %c0_17 = arith.constant 0 : index
    %c0_18 = arith.constant 0 : index
    %19 = vector.load %arg8[%c0_17, %c0_18] : memref<1x256xf32, #tpu.memory_space<vmem>>, vector<1x256xf32>
    %20 = vector.broadcast %19 : vector<1x256xf32> to vector<8x256xf32>
    %21 = arith.mulf %18, %20 : vector<8x256xf32>
    %cst_19 = arith.constant dense<0.000000e+00> : vector<8xf32>
    %22 = vector.multi_reduction <add>, %21, %cst_19 [1] : vector<8x256xf32> to vector<8xf32>
    %23 = vector.shape_cast %22 : vector<8xf32> to vector<8x1xf32>
    %c0_20 = arith.constant 0 : index
    %c0_21 = arith.constant 0 : index
    %24 = vector.load %arg9[%c0_20, %c0_21] : memref<1x1xf32, #tpu.memory_space<vmem>>, vector<1x1xf32>
    %25 = vector.broadcast %24 : vector<1x1xf32> to vector<8x1xf32>
    %26 = arith.addf %23, %25 : vector<8x1xf32>
    %c0_22 = arith.constant 0 : index
    %c0_23 = arith.constant 0 : index
    %27 = vector.load %arg10[%c0_22, %c0_23] : memref<8x1xf32, #tpu.memory_space<vmem>>, vector<8x1xf32>
    tpu.vector_store %arg10[%c0_22, %c0_23], %26 {strides = array<i32>} : memref<8x1xf32, #tpu.memory_space<vmem>>, vector<8x1xf32>,
    return
  }
  func.func @transform_0(%arg0: i32) -> (i32, i32) {
    %c0_i32 = arith.constant 0 : i32
    %c0_i32_0 = arith.constant 0 : i32
    return %arg0, %c0_i32 : i32, i32
  }
  func.func @transform_1(%arg0: i32) -> (i32, i32) {
    %c0_i32 = arith.constant 0 : i32
    %c0_i32_0 = arith.constant 0 : i32
    return %arg0, %c0_i32 : i32, i32
  }
  func.func @transform_2(%arg0: i32) -> (i32, i32) {
    %c0_i32 = arith.constant 0 : i32
    %c0_i32_0 = arith.constant 0 : i32
    %c0_i32_1 = arith.constant 0 : i32
    return %c0_i32, %c0_i32_0 : i32, i32
  }
  func.func @transform_3(%arg0: i32) -> (i32, i32) {
    %c0_i32 = arith.constant 0 : i32
    %c0_i32_0 = arith.constant 0 : i32
    %c0_i32_1 = arith.constant 0 : i32
    return %c0_i32, %c0_i32_0 : i32, i32
  }
  func.func @transform_4(%arg0: i32) -> (i32, i32) {
    %c0_i32 = arith.constant 0 : i32
    %c0_i32_0 = arith.constant 0 : i32
    %c0_i32_1 = arith.constant 0 : i32
    return %c0_i32, %c0_i32_0 : i32, i32
  }
  func.func @transform_5(%arg0: i32) -> (i32, i32) {
    %c0_i32 = arith.constant 0 : i32
    %c0_i32_0 = arith.constant 0 : i32
    %c0_i32_1 = arith.constant 0 : i32
    return %c0_i32, %c0_i32_0 : i32, i32
  }
  func.func @transform_6(%arg0: i32) -> (i32, i32) {
    %c0_i32 = arith.constant 0 : i32
    %c0_i32_0 = arith.constant 0 : i32
    %c0_i32_1 = arith.constant 0 : i32
    return %c0_i32, %c0_i32_0 : i32, i32
  }
  func.func @transform_7(%arg0: i32) -> (i32, i32) {
    %c0_i32 = arith.constant 0 : i32
    %c0_i32_0 = arith.constant 0 : i32
    %c0_i32_1 = arith.constant 0 : i32
    return %c0_i32, %c0_i32_0 : i32, i32
  }
  func.func @transform_8(%arg0: i32) -> (i32, i32) {
    %c0_i32 = arith.constant 0 : i32
    %c0_i32_0 = arith.constant 0 : i32
    %c0_i32_1 = arith.constant 0 : i32
    return %c0_i32, %c0_i32_0 : i32, i32
  }
  func.func @transform_9(%arg0: i32) -> (i32, i32) {
    %c0_i32 = arith.constant 0 : i32
    %c0_i32_0 = arith.constant 0 : i32
    return %arg0, %c0_i32 : i32, i32
  }
}

</mosaic_0001>

<bundles_post_ra>
// kernel: tpu_custom_call.1
= control target key start
LH: loop header
LB: loop body
LE: loop exit
PB: predicated region body
PF: predicated region fallthrough
CT: control target
= control target key end

     0   :  { %s812_s0 = inlined_call_operand.hbm [shape: f32[8,17], index: 0, kind: input, shape index: {}]   ;;  %s813_s1 = inlined_call_operand.hbm [shape: f32[8,6], index: 1, kind: input, shape index: {}]   ;;  %s814_s2 = inlined_call_operand.hbm [shape: f32[17,256], index: 2, kind: input, shape index: {}]   ;;  %s815_s3 = inlined_call_operand.hbm [shape: f32[6,256], index: 3, kind: input, shape index: {}]   ;;  %s816_s4 = inlined_call_operand.vmem [shape: f32[1,256], index: 4, kind: input, shape index: {}]   ;;  %s817_s5 = inlined_call_operand.hbm [shape: f32[256,256], index: 5, kind: input, shape index: {}]   ;;  %s818_s6 = inlined_call_operand.vmem [shape: f32[1,256], index: 6, kind: input, shape index: {}]   ;;  %s819_s7 = inlined_call_operand.vmem [shape: f32[1,256], index: 7, kind: input, shape index: {}]   ;;  %s820_s8 = inlined_call_operand.<no memory space> [shape: f32[1,1], index: 8, kind: input, shape index: {}]   ;;  %s821_s9 = inlined_call_operand.vmem [shape: f32[8,1], index: 9, kind: output, shape index: {}]  }
   0x1   :  { %v14_v0 = vstv %s820_s8 }
   0x2   :  { %15 = vst [vmem:[#allocation2] sm:$0x1] %v14_v0 }
   0x3   :  { %16 = vsyncpa [#allocation4], 0 }
   0x4   :  { %17 = vsyncpa [#allocation6], 0 }
   0x5   :  { %18 = vsyncpa [#allocation9], 0  ;;  %s670_s11 = smov [#allocation5]   ;;  %s671_s13 = smov [#allocation8]  }
   0x6   :  { %s35_s12 = sshll.u32 %s670_s11, 4  ;;  %s57_s14 = sshll.u32 %s671_s13, 4  ;;  %s36_s12 = int_to_ptr.vmem [resolvable:$true] %s35_s12  ;;  %s58_s14 = int_to_ptr.vmem [resolvable:$true] %s57_s14 }
   0x7   :  { %s554_s17 = scalar_lea.hbm %s813_s1, 128 }
   0x8   :  { %p555_p0 = scmp.ne.s32.totalorder %s813_s1, %s554_s17  ;;  %p558_p1 = scmp.lt.u32.totalorder %s554_s17, %s813_s1 }
   0xa   :  { %p560_p2 = pnand %p558_p1, %p555_p0 }
   0xc   :  { %563 = shalt.err (!%p560_p2)
}
   0xd   :  { %s564_s21 = scalar_lea.vmem %s36_s12, 128  ;;  %p569_p4 = scmp.lt.s32.totalorder %s36_s12, %s36_s12 }
   0xe   :  { %p565_p3 = scmp.ne.s32.totalorder %s36_s12, %s564_s21  ;;  %p570_p5 = scmp.lt.s32.totalorder %s564_s21, %s564_s21 }
  0x10   :  { %p571_p6 = por %p570_p5, %p569_p4 }
  0x12   :  { %p572_p7 = pnand %p571_p6, %p565_p3 }
  0x14   :  { %575 = shalt.err (!%p572_p7)
}
  0x15   :  { %38 = dma.hbm_to_vmem [thread:$0]  %s813_s1, 128, %s36_s12, [#allocation6]  }
  0x16   :  { %s576_s26 = scalar_lea.hbm %s815_s3, 256 }
  0x17   :  { %p577_p8 = scmp.ne.s32.totalorder %s815_s3, %s576_s26  ;;  %p580_p9 = scmp.lt.u32.totalorder %s576_s26, %s815_s3 }
  0x19   :  { %p582_p10 = pnand %p580_p9, %p577_p8 }
  0x1b   :  { %585 = shalt.err (!%p582_p10)
}
  0x1c   :  { %s586_s10 = scalar_lea.vmem %s58_s14, 256  ;;  %p591_p12 = scmp.lt.s32.totalorder %s58_s14, %s58_s14 }
  0x1d   :  { %p587_p11 = scmp.ne.s32.totalorder %s58_s14, %s586_s10  ;;  %p592_p13 = scmp.lt.s32.totalorder %s586_s10, %s586_s10 }
  0x1f   :  { %p593_p0 = por %p592_p13, %p591_p12 }
  0x21   :  { %p594_p1 = pnand %p593_p0, %p587_p11 }
  0x23   :  { %597 = shalt.err (!%p594_p1)
}
  0x24   :  { %60 = dma.hbm_to_vmem [thread:$0]  %s815_s3, 256, %s58_s14, [#allocation9]  }
  0x25   :  { %s672_s12 = smov [#allocation3]   ;;  %s673_s15 = smov [#allocation7]  }
  0x26   :  { %s25_s13 = sshll.u32 %s672_s12, 4  ;;  %s44_s16 = sshll.u32 %s673_s15, 4  ;;  %s26_s13 = int_to_ptr.vmem [resolvable:$true] %s25_s13  ;;  %s755_s16 = int_to_ptr.vmem [resolvable:$true] %s44_s16 }
  0x27   :  { %s598_s19 = scalar_lea.hbm %s812_s0, 128 }
  0x28   :  { %p599_p2 = scmp.ne.s32.totalorder %s812_s0, %s598_s19  ;;  %p602_p3 = scmp.lt.u32.totalorder %s598_s19, %s812_s0 }
  0x2a   :  { %p604_p4 = pnand %p602_p3, %p599_p2 }
  0x2c   :  { %607 = shalt.err (!%p604_p4)
}
  0x2d   :  { %s608_s3 = scalar_lea.vmem %s26_s13, 128  ;;  %p613_p6 = scmp.lt.s32.totalorder %s26_s13, %s26_s13 }
  0x2e   :  { %p609_p5 = scmp.ne.s32.totalorder %s26_s13, %s608_s3  ;;  %p614_p7 = scmp.lt.s32.totalorder %s608_s3, %s608_s3 }
  0x30   :  { %p615_p8 = por %p614_p7, %p613_p6 }
  0x32   :  { %p616_p9 = pnand %p615_p8, %p609_p5 }
  0x34   :  { %619 = shalt.err (!%p616_p9)
}
  0x35   :  { %28 = dma.hbm_to_vmem [thread:$0]  %s812_s0, 128, %s26_s13, [#allocation4]  }
  0x36   :  { %s620_s26 = scalar_lea.hbm %s814_s2, 768 }
  0x37   :  { %p621_p10 = scmp.ne.s32.totalorder %s814_s2, %s620_s26  ;;  %p624_p11 = scmp.lt.u32.totalorder %s620_s26, %s814_s2 }
  0x39   :  { %p626_p12 = pnand %p624_p11, %p621_p10 }
  0x3b   :  { %629 = shalt.err (!%p626_p12)
}
  0x3c   :  { %s630_s10 = scalar_lea.vmem %s755_s16, 768  ;;  %p635_p0 = scmp.lt.s32.totalorder %s755_s16, %s755_s16 }
  0x3d   :  { %p631_p13 = scmp.ne.s32.totalorder %s755_s16, %s630_s10  ;;  %p636_p1 = scmp.lt.s32.totalorder %s630_s10, %s630_s10 }
  0x3f   :  { %p637_p2 = por %p636_p1, %p635_p0 }
  0x41   :  { %p638_p3 = pnand %p637_p2, %p631_p13 }
  0x43   :  { %641 = shalt.err (!%p638_p3)
}
  0x44   :  { %s674_s0 = smov 256   ;;  %s675_s1 = smov 16  }
  0x45   :  { %50 = dma.hbm_to_vmem [thread:$0]  %s814_s2, 768, %s755_s16, [#allocation6], %s674_s0, %s674_s0, %s675_s1  }
  0x46   :  { %s676_s13 = smov [#allocation10]   ;;  %s642_s19 = scalar_lea.hbm %s817_s5, 8192 }
  0x47   :  { %s68_s15 = sshll.u32 %s676_s13, 4  ;;  %p643_p4 = scmp.ne.s32.totalorder %s817_s5, %s642_s19  ;;  %s69_s15 = int_to_ptr.vmem [resolvable:$true] %s68_s15 }
  0x48   :  { %p646_p5 = scmp.lt.u32.totalorder %s642_s19, %s817_s5 }
  0x4a   :  { %p648_p6 = pnand %p646_p5, %p643_p4 }
  0x4c   :  { %651 = shalt.err (!%p648_p6)
}
  0x4d   :  { %s652_s3 = scalar_lea.vmem %s69_s15, 8192  ;;  %p657_p8 = scmp.lt.s32.totalorder %s69_s15, %s69_s15 }
  0x4e   :  { %p653_p7 = scmp.ne.s32.totalorder %s69_s15, %s652_s3  ;;  %p658_p9 = scmp.lt.s32.totalorder %s652_s3, %s652_s3 }
  0x50   :  { %p659_p10 = por %p658_p9, %p657_p8 }
  0x52   :  { %p660_p11 = pnand %p659_p10, %p653_p7 }
  0x54   :  { %663 = shalt.err (!%p660_p11)
}
  0x55   :  { %74 = dma.hbm_to_vmem [thread:$0]  %s817_s5, 8192, %s69_s15, [#allocation9], %s674_s0, %s674_s0, %s675_s1  }
  0x56   :  { %664 = dma.done.wait [#allocation4], 128  }
  0x57   :  { %665 = vsyncadd [#allocation4], 4294967168 }
  0x58   :  { %666 = dma.done.wait [#allocation6], 896  }
  0x59   :  { %667 = vsyncadd [#allocation6], 4294966400 }
  0x5a   :  { %668 = dma.done.wait [#allocation9], 8448  }
  0x5b   :  { %669 = vsyncadd [#allocation9], 4294958848  ;;  %v677_v1 = vmov 0.0   ;;  %vm110_vm0 = vcmask 1045504   ;;  %v105_v2 = vld [vmem:[#allocation8 + $0x8] sm:$0x3f] }
  0x5c   :  { %181 = vmatprep.mubr.f32.mxu0 %v677_v1  ;;  %v104_v3 = vld [vmem:[#allocation8] sm:$0x3f]  ;;  %v103_v4 = vld [vmem:[#allocation5] sm:$0xff]  ;;  %vm106_vm1 = vcmask 48128   ;;  %469 = vmatprep.subr.msk.mxu0 %vm110_vm0, %v105_v2  ;;  %v98_v5 = vld [vmem:[#allocation7 + $0x8] sm:$0xff]  ;;  %vm192_vm2 = vcmask 1040384  }
  0x5d   :  { %v100_v6 = vld [vmem:[#allocation7 + $0x18] sm:$0xff]  ;;  %v97_v7 = vld [vmem:[#allocation7] sm:$0xff]  ;;  %470 = vmatpush1.msk.msra.mxu0 %vm110_vm0, %v104_v3  ;;  %v99_v9 = vld [vmem:[#allocation7 + $0x10] sm:$0xff]  ;;  %vm188_vm3 = vcmask 138240   ;;  %vm460_vm4 = vcmask 7168  }
  0x5e   :  { %v476_v8 = vpack.c.bf16 %v100_v6, %v98_v5  ;;  %471 = vmatmul.mubr.msk.f32.vlgmr.msra.gmra.mrb[0].mxu0 %vm106_vm1, %v103_v4  ;;  %v478_v10 = vpack.c.bf16 %v99_v9, %v97_v7  ;;  %v102_v11 = vld [vmem:[#allocation7 + $0x28] sm:$0x1]  ;;  %v289_v13 = vld [vmem:[#allocation10 + $0x18] sm:$0xff]  ;;  %v286_v15 = vld [vmem:[#allocation10] sm:$0xff] }
  0x5f   :  { %v287_v12 = vld [vmem:[#allocation10 + $0x8] sm:$0xff]  ;;  %263 = vmatprep.mubr.f32.mxu0 %v677_v1  ;;  %v288_v16 = vld [vmem:[#allocation10 + $0x10] sm:$0xff]  ;;  %v293_v19 = vld [vmem:[#allocation10 + $0x38] sm:$0xff] }
  0x60   :  { %477 = vmatprep.subr.bf16.mxu0 %v476_v8  ;;  %v480_v14 = vpack.c.bf16 %v289_v13, %v287_v12  ;;  %v291_v17 = vld [vmem:[#allocation10 + $0x28] sm:$0xff]  ;;  %v482_v18 = vpack.c.bf16 %v288_v16, %v286_v15  ;;  %v290_v20 = vld [vmem:[#allocation10 + $0x20] sm:$0xff]  ;;  %v292_v21 = vld [vmem:[#allocation10 + $0x30] sm:$0xff] }
  0x61   :  { %479 = vmatpush1.bf16.msra.mxu0 %v478_v10  ;;  %v101_v22 = vld [vmem:[#allocation7 + $0x20] sm:$0x1]  ;;  %v484_v23 = vpack.c.bf16 %v293_v19, %v291_v17  ;;  %v295_v24 = vld [vmem:[#allocation10 + $0x48] sm:$0xff]  ;;  %v297_v25 = vld [vmem:[#allocation10 + $0x58] sm:$0xff]  ;;  %v486_v26 = vpack.c.bf16 %v292_v21, %v290_v20 }
  0x62   :  { %472 = vmatprep.subr.msk.mxu0 %vm192_vm2, %v102_v11  ;;  %481 = vmatprep.subr.bf16.mxu1 %v480_v14  ;;  %v96_v27 = vld [vmem:[#allocation3] sm:$0xff]  ;;  %v488_v28 = vpack.c.bf16 %v297_v25, %v295_v24  ;;  %v294_v29 = vld [vmem:[#allocation10 + $0x40] sm:$0xff]  ;;  %v299_v31 = vld [vmem:[#allocation10 + $0x68] sm:$0xff] }
  0x63   :  { %483 = vmatpush1.bf16.msra.mxu1 %v482_v18  ;;  %v296_v30 = vld [vmem:[#allocation10 + $0x50] sm:$0xff]  ;;  %v301_v32 = vld [vmem:[#allocation10 + $0x78] sm:$0xff]  ;;  %v298_v35 = vld [vmem:[#allocation10 + $0x60] sm:$0xff] }
  0x64   :  { %485 = vmatprep.subr.bf16.mxu1 %v484_v23  ;;  %v490_v33 = vpack.c.bf16 %v296_v30, %v294_v29  ;;  %v492_v34 = vpack.c.bf16 %v301_v32, %v299_v31  ;;  %v300_v36 = vld [vmem:[#allocation10 + $0x70] sm:$0xff]  ;;  %v303_v37 = vld [vmem:[#allocation10 + $0x88] sm:$0xff]  ;;  %v305_v38 = vld [vmem:[#allocation10 + $0x98] sm:$0xff] }
  0x65   :  { %473 = vmatpush1.msk.msra.mxu0 %vm192_vm2, %v101_v22  ;;  %v494_v39 = vpack.c.bf16 %v300_v36, %v298_v35  ;;  %v496_v40 = vpack.c.bf16 %v305_v38, %v303_v37  ;;  %v302_v41 = vld [vmem:[#allocation10 + $0x80] sm:$0xff]  ;;  %v304_v42 = vld [vmem:[#allocation10 + $0x90] sm:$0xff]  ;;  %v307_v43 = vld [vmem:[#allocation10 + $0xa8] sm:$0xff] }
  0x66   :  { %474 = vmatmul.mubr.msk.f32.vlgmr.msra.gmra.mrb[0].mxu0 %vm188_vm3, %v96_v27  ;;  %v309_v44 = vld [vmem:[#allocation10 + $0xb8] sm:$0xff]  ;;  %v498_v45 = vpack.c.bf16 %v304_v42, %v302_v41  ;;  %v306_v47 = vld [vmem:[#allocation10 + $0xa0] sm:$0xff]  ;;  %v308_v48 = vld [vmem:[#allocation10 + $0xb0] sm:$0xff] }
  0x67   :  { %487 = vmatpush1.bf16.msra.mxu1 %v486_v26  ;;  %v500_v46 = vpack.c.bf16 %v309_v44, %v307_v43  ;;  %v311_v49 = vld [vmem:[#allocation10 + $0xc8] sm:$0xff]  ;;  %v313_v50 = vld [vmem:[#allocation10 + $0xd8] sm:$0xff]  ;;  %v502_v51 = vpack.c.bf16 %v308_v48, %v306_v47  ;;  %v310_v53 = vld [vmem:[#allocation10 + $0xc0] sm:$0xff] }
  0x68   :  { %489 = vmatprep.subr.bf16.mxu1 %v488_v28  ;;  %v504_v52 = vpack.c.bf16 %v313_v50, %v311_v49  ;;  %v312_v54 = vld [vmem:[#allocation10 + $0xd0] sm:$0xff]  ;;  %v315_v55 = vld [vmem:[#allocation10 + $0xe8] sm:$0xff]  ;;  %v317_v56 = vld [vmem:[#allocation10 + $0xf8] sm:$0xff] }
  0x69   :  { %v506_v57 = vpack.c.bf16 %v312_v54, %v310_v53  ;;  %v508_v58 = vpack.c.bf16 %v317_v56, %v315_v55  ;;  %v314_v59 = vld [vmem:[#allocation10 + $0xe0] sm:$0xff]  ;;  %v316_v60 = vld [vmem:[#allocation10 + $0xf0] sm:$0xff]  ;;  %v319_v61 = vld [vmem:[#allocation10 + $0x108] sm:$0xff] }
  0x6a   :  { %v321_v62 = vld [vmem:[#allocation10 + $0x118] sm:$0xff]  ;;  %v510_v63 = vpack.c.bf16 %v316_v60, %v314_v59  ;;  %v318_v1 = vld [vmem:[#allocation10 + $0x100] sm:$0xff]  ;;  %v320_v2 = vld [vmem:[#allocation10 + $0x110] sm:$0xff] }
  0x6b   :  { %491 = vmatpush1.bf16.msra.mxu1 %v490_v33  ;;  %v512_v0 = vpack.c.bf16 %v321_v62, %v319_v61  ;;  %v323_v3 = vld [vmem:[#allocation10 + $0x128] sm:$0xff]  ;;  %v325_v4 = vld [vmem:[#allocation10 + $0x138] sm:$0xff]  ;;  %v514_v5 = vpack.c.bf16 %v320_v2, %v318_v1  ;;  %v322_v7 = vld [vmem:[#allocation10 + $0x120] sm:$0xff] }
  0x6c   :  { %493 = vmatprep.subr.bf16.mxu1 %v492_v34  ;;  %v516_v6 = vpack.c.bf16 %v325_v4, %v323_v3  ;;  %v324_v8 = vld [vmem:[#allocation10 + $0x130] sm:$0xff]  ;;  %v327_v9 = vld [vmem:[#allocation10 + $0x148] sm:$0xff]  ;;  %v329_v10 = vld [vmem:[#allocation10 + $0x158] sm:$0xff] }
  0x6d   :  { %v518_v11 = vpack.c.bf16 %v324_v8, %v322_v7  ;;  %v520_v12 = vpack.c.bf16 %v329_v10, %v327_v9  ;;  %v326_v13 = vld [vmem:[#allocation10 + $0x140] sm:$0xff]  ;;  %v328_v14 = vld [vmem:[#allocation10 + $0x150] sm:$0xff]  ;;  %v331_v15 = vld [vmem:[#allocation10 + $0x168] sm:$0xff] }
  0x6e   :  { %v333_v16 = vld [vmem:[#allocation10 + $0x178] sm:$0xff]  ;;  %v522_v17 = vpack.c.bf16 %v328_v14, %v326_v13  ;;  %v330_v19 = vld [vmem:[#allocation10 + $0x160] sm:$0xff]  ;;  %v332_v20 = vld [vmem:[#allocation10 + $0x170] sm:$0xff] }
  0x6f   :  { %495 = vmatpush1.bf16.msra.mxu1 %v494_v39  ;;  %v524_v18 = vpack.c.bf16 %v333_v16, %v331_v15  ;;  %v335_v21 = vld [vmem:[#allocation10 + $0x188] sm:$0xff]  ;;  %v337_v22 = vld [vmem:[#allocation10 + $0x198] sm:$0xff]  ;;  %v526_v23 = vpack.c.bf16 %v332_v20, %v330_v19  ;;  %v334_v25 = vld [vmem:[#allocation10 + $0x180] sm:$0xff] }
  0x70   :  { %497 = vmatprep.subr.bf16.mxu1 %v496_v40  ;;  %v528_v24 = vpack.c.bf16 %v337_v22, %v335_v21  ;;  %v336_v26 = vld [vmem:[#allocation10 + $0x190] sm:$0xff]  ;;  %v339_v27 = vld [vmem:[#allocation10 + $0x1a8] sm:$0xff]  ;;  %v341_v28 = vld [vmem:[#allocation10 + $0x1b8] sm:$0xff] }
  0x71   :  { %v530_v29 = vpack.c.bf16 %v336_v26, %v334_v25  ;;  %v532_v30 = vpack.c.bf16 %v341_v28, %v339_v27  ;;  %v338_v31 = vld [vmem:[#allocation10 + $0x1a0] sm:$0xff]  ;;  %v340_v32 = vld [vmem:[#allocation10 + $0x1b0] sm:$0xff]  ;;  %v343_v33 = vld [vmem:[#allocation10 + $0x1c8] sm:$0xff] }
  0x72   :  { %v345_v34 = vld [vmem:[#allocation10 + $0x1d8] sm:$0xff]  ;;  %v534_v35 = vpack.c.bf16 %v340_v32, %v338_v31  ;;  %v342_v37 = vld [vmem:[#allocation10 + $0x1c0] sm:$0xff]  ;;  %v344_v38 = vld [vmem:[#allocation10 + $0x1d0] sm:$0xff] }
  0x73   :  { %499 = vmatpush1.bf16.msra.mxu1 %v498_v45  ;;  %v536_v36 = vpack.c.bf16 %v345_v34, %v343_v33  ;;  %v538_v39 = vpack.c.bf16 %v344_v38, %v342_v37  ;;  %v347_v40 = vld [vmem:[#allocation10 + $0x1e8] sm:$0xff]  ;;  %v349_v41 = vld [vmem:[#allocation10 + $0x1f8] sm:$0xff]  ;;  %v346_v43 = vld [vmem:[#allocation10 + $0x1e0] sm:$0xff] }
  0x74   :  { %501 = vmatprep.subr.bf16.mxu1 %v500_v46  ;;  %v540_v42 = vpack.c.bf16 %v349_v41, %v347_v40  ;;  %v348_v44 = vld [vmem:[#allocation10 + $0x1f0] sm:$0xff]  ;;  %v272_v46 = vlaneseq  ;;  %v475_v10 = vld [vmem:[#allocation2] ss:$0 sm:$0xff] }
  0x75   :  { %v542_v45 = vpack.c.bf16 %v348_v44, %v346_v43  ;;  %v270_v49 = vld [vmem:[%s816_s4] sm:$0x3] }
  0x76   :  { %v273_v47 = vshrl.u32 %v272_v46, 7  ;;  %v350_v59 = vld [vmem:[%s818_s6] sm:$0x3] }
  0x77   :  { %503 = vmatpush1.bf16.msra.mxu1 %v502_v51  ;;  %v435_v62 = vld [vmem:[%s819_s7] sm:$0x3] }
  0x78   :  { %505 = vmatprep.subr.bf16.mxu1 %v504_v52  ;;  %v274_v48 = vsub.s32 0, %v273_v47  ;;  %v278_v50 = vsub.s32 1, %v273_v47 }
  0x7a   :  { %v275_v51 = vrot.slane %v270_v49, %v274_v48  ;;  %v279_v52 = vrot.slane %v270_v49, %v278_v50  ;;  %v355_v60 = vrot.slane %v350_v59, %v274_v48  ;;  %v359_v61 = vrot.slane %v350_v59, %v278_v50 }
  0x7b   :  { %507 = vmatpush1.bf16.msra.mxu1 %v506_v57  ;;  %v440_v2 = vrot.slane %v435_v62, %v274_v48  ;;  %v444_v4 = vrot.slane %v435_v62, %v278_v50 }
  0x7c   :  { %509 = vmatprep.subr.bf16.mxu1 %v508_v58 }
  0x7f   :  { %511 = vmatpush1.bf16.msra.mxu1 %v510_v63 }
  0x80   :  { %513 = vmatprep.subr.bf16.mxu1 %v512_v0 }
  0x83   :  { %515 = vmatpush1.bf16.msra.mxu1 %v514_v5 }
  0x84   :  { %517 = vmatprep.subr.bf16.mxu1 %v516_v6 }
  0x87   :  { %519 = vmatpush1.bf16.msra.mxu1 %v518_v11 }
  0x88   :  { %521 = vmatprep.subr.bf16.mxu1 %v520_v12 }
  0x8b   :  { %523 = vmatpush1.bf16.msra.mxu1 %v522_v17 }
  0x8c   :  { %525 = vmatprep.subr.bf16.mxu1 %v524_v18 }
  0x8f   :  { %527 = vmatpush1.bf16.msra.mxu1 %v526_v23 }
  0x90   :  { %529 = vmatprep.subr.bf16.mxu1 %v528_v24 }
  0x93   :  { %531 = vmatpush1.bf16.msra.mxu1 %v530_v29 }
  0x94   :  { %533 = vmatprep.subr.bf16.mxu1 %v532_v30 }
  0x97   :  { %535 = vmatpush1.bf16.msra.mxu1 %v534_v35 }
  0x98   :  { %537 = vmatprep.subr.bf16.mxu1 %v536_v36 }
  0x9b   :  { %539 = vmatpush1.bf16.msra.mxu1 %v538_v39 }
  0x9c   :  { %541 = vmatprep.subr.bf16.mxu1 %v540_v42 }
  0x9f   :  { %543 = vmatpush1.bf16.msra.mxu1 %v542_v45 }
 0x139   :  { %v265_v53 = vpop.f32.mrb[0].mxu0 }
 0x13a   :  { %v282_v54 = vadd.f32 %v275_v51, %v265_v53  ;;  %v267_v55 = vpop.f32.mrb[1].mxu0 }
 0x13b   :  { %v283_v56 = vadd.f32 %v279_v52, %v267_v55 }
 0x13c   :  { %v284_v58 = vmax.f32 %v282_v54, 0.0 }
 0x13d   :  { %v285_v57 = vmax.f32 %v283_v56, 0.0 }
 0x13f   :  { %426 = vmatprep.mubr.f32.mxu1 %v285_v57 }
 0x140   :  { %427 = vmatmul.mubr.f32.vlgmr.msra.gmra.mrb[0].mxu1 %v284_v58 }
 0x213   :  { %v428_v63 = vpop.f32.mrb[0].mxu1 }
 0x214   :  { %v429_v0 = vadd.f32 %v428_v63, %v355_v60  ;;  %v430_v1 = vpop.f32.mrb[1].mxu1 }
 0x215   :  { %v431_v3 = vadd.f32 %v430_v1, %v359_v61 }
 0x216   :  { %v433_v5 = vmax.f32 %v429_v0, 0.0 }
 0x217   :  { %v434_v6 = vmax.f32 %v431_v3, 0.0 }
 0x218   :  { %v447_v7 = vmul.f32 %v440_v2, %v433_v5 }
 0x219   :  { %v448_v8 = vmul.f32 %v444_v4, %v434_v6 }
 0x21b   :  { %v449_v9 = vadd.f32 %v448_v8, %v447_v7 }
 0x21d   :  { %450 = vadd.xlane.f32.xlu0 %v449_v9 }
 0x2aa   :  { %v451_v11 = vpop.xlane.xlu0 %450 }
 0x2ab   :  { %v459_v12 = vadd.f32 %v475_v10, %v451_v11 }
 0x2ad   :  { %461 = vst.msk [vmem:[%s821_s9] sm:$0xff] %vm460_vm4, %v459_v12 }
 0x2ae   :  { %466 = vsyncpa [#allocation4], 1 }
 0x2af   :  { %467 = vsyncpa [#allocation6], 1 }
 0x2b0   :  { %468 = vsyncpa [#allocation9], 1 }

</bundles_post_ra>
